<compile_context>
chip_gen: v6e
topology: v6e:2x2x1
jax: 0.10.0
libtpu: 0.0.40
codegen_flags: <defaults>
</compile_context>

<pallas_src>
import functools
import math

import jax
import jax.numpy as jnp
from jax import lax
from jax.experimental import pallas as pl
from jax.experimental.pallas import tpu as pltpu


def _l2_normalize(a, eps=1e-12):
    """Row-wise L2 normalize, matching F.normalize: x / max(||x||_2, eps)."""
    a = a.astype(jnp.float32)
    norm = jnp.sqrt(jnp.sum(a * a, axis=-1, keepdims=True))
    return a / jnp.maximum(norm, eps)


def _pick_tile(n, target, multiples):
    """Largest divisor of n that is <= target and a multiple of one of
    `multiples` (tried in order).  Falls back to n (untiled); callers guard the
    fallback against the VMEM budget and fail loudly if it does not fit."""
    target = max(1, min(target, n))
    for m in multiples:
        d = (target // m) * m
        while d >= m:
            if n % d == 0:
                return d
            d -= m
    return n


def _vmem_caps():
    """(compiler vmem limit, tile-planning budget) with headroom under the
    physical per-core VMEM (64 MiB on v7x, 128 MiB on v5e/v6e)."""
    try:
        cap = int(pltpu.get_tpu_info().vmem_capacity_bytes)
    except Exception:
        cap = 64 * 1024 * 1024            # conservative default (v7x size)
    limit = max(32 * 1024 * 1024, cap - 8 * 1024 * 1024)
    budget = max(24 * 1024 * 1024, limit - 8 * 1024 * 1024)
    return limit, budget


def _fml_kernel(s_scale, tile_c, fold_margin, precision,
                xn_ref, wn_ref, label_ref,
                out_ref, margin_ref,
                l_acc, ct_acc):
    ci = pl.program_id(1)
    last_c = pl.num_programs(1) - 1

    @pl.when(ci == 0)
    def _init():
        l_acc[...] = jnp.zeros_like(l_acc)
        ct_acc[...] = jnp.zeros_like(ct_acc)

    # cosine tile: contract D on both operands -> W stays in its natural (C, D)
    # layout (no XLU transpose).  Inputs are pre-normalized and pre-cast in the
    # wrapper; accumulation stays f32 on the MXU.
    cos = lax.dot_general(
        xn_ref[...], wn_ref[...],
        dimension_numbers=(((1,), (1,)), ((), ())),
        precision=precision,
        preferred_element_type=jnp.float32)                      # (tb, tc)

    scaled = (jnp.float32(s_scale) * cos).astype(out_ref.dtype)
    if fold_margin:
        # C-resident output block: write this lane-dense column slice; the
        # margin is subtracted in-place at the last C tile (no fixup pass).
        col0 = pl.multiple_of(ci * tile_c, tile_c)
        out_ref[:, pl.ds(col0, tile_c)] = scaled
    else:
        out_ref[...] = scaled

    # Online softmax stats.  cosine is analytically bounded in [-1, 1] (both
    # operands are unit rows), so exp() is in [e^-1, e] and the max-shift of a
    # stabilized softmax is unnecessary.
    l_acc[...] += jnp.sum(jnp.exp(cos), axis=-1, keepdims=True)

    label = label_ref[...]                                       # (tb, 1) int32
    cols = lax.broadcasted_iota(jnp.int32, cos.shape, 1) + ci * tile_c
    hit = cols == label                                          # bool mask only
    ct_acc[...] += jnp.sum(jnp.where(hit, cos, 0.0), axis=-1, keepdims=True)

    @pl.when(ci == last_c)
    def _finalize():
        p_true = jnp.exp(ct_acc[...]) / l_acc[...]               # softmax[i, label[i]]
        margin = jnp.float32(0.5 * s_scale) * jnp.exp(-p_true)   # (tb, 1)
        margin_ref[...] = margin
        if fold_margin:
            all_cols = lax.broadcasted_iota(jnp.int32, out_ref.shape, 1)
            hit_all = all_cols == label
            out_ref[...] = (out_ref[...]
                            - jnp.where(hit_all, margin, 0.0).astype(out_ref.dtype))


def fml_forward(x, weight, label, s=64.0, *,
                block_b=512, block_c=512,
                matmul_dtype=jnp.bfloat16, out_dtype=jnp.float32,
                fold_margin=None):
    """x: (B, D) f32, weight: (C, D) f32, label: (B,) int -> (B, C) out_dtype.

    matmul_dtype=bf16 (default) feeds the v5e/v6e/v7x MXU at native rate with
    f32 accumulation; pass jnp.float32 for a bit-faithful match to the f32
    PyTorch module (expect ~0.05-0.2 max-abs deviation from f32 with bf16 at
    s=64).
    """
    B, D = x.shape
    C, D2 = weight.shape
    assert D == D2, (x.shape, weight.shape)

    mm_dtype = jnp.dtype(matmul_dtype)
    mm_bytes = mm_dtype.itemsize
    out_bytes = jnp.dtype(out_dtype).itemsize
    vmem_limit, budget = _vmem_caps()

    # ---- tile selection ----------------------------------------------------
    # Rows: sublane multiples (16 for bf16 packing); cap at B//2 so the
    # "parallel" B axis has >= 2 tiles (both v7x TensorCores stay busy).
    # Cols: 256/128 multiples (MXU-friendly, lane-dense stores).
    row_mults = (16, 8) if mm_bytes == 2 else (8,)
    tb_target = block_b
    if B >= 2 * row_mults[-1]:
        tb_target = min(tb_target, max(row_mults[-1], B // 2))
    tb = _pick_tile(B, tb_target, row_mults)
    tc = _pick_tile(C, block_c, (256, 128))

    def _est(tb_, tc_, fold_):
        e = 2 * tb_ * D * mm_bytes            # xn block (double-buffered)
        e += 2 * tc_ * D * mm_bytes           # W block (double-buffered)
        e += 2 * tb_ * 4 * 2                  # labels block + margin out
        e += 2 * tb_ * 4 * 2                  # f32 accumulator scratch
        e += 2 * tb_ * (C if fold_ else tc_) * out_bytes   # logits block
        return e

    fold = fold_margin
    if fold is None:
        fold = _est(tb, tc, True) <= budget

    for _ in range(64):
        if _est(tb, tc, fold) <= budget:
            break
        if fold and 2 * tb * C * out_bytes > budget // 2:
            new_tb = _pick_tile(B, max(row_mults[-1], tb // 2), row_mults)
            if new_tb < tb:
                tb = new_tb
                continue
            fold = False                      # huge C: fall back to scatter fix
            continue
        new_tc = _pick_tile(C, max(128, tc // 2), (256, 128))
        if new_tc < tc:
            tc = new_tc
            continue
        new_tb = _pick_tile(B, max(row_mults[-1], tb // 2), row_mults)
        if new_tb < tb:
            tb = new_tb
            continue
        if fold:
            fold = False
            continue
        break
    if _est(tb, tc, fold) > budget:
        raise ValueError(
            f"FML tiles (tb={tb}, tc={tc}, fold={fold}) exceed the VMEM budget "
            f"of {budget} bytes for B={B}, C={C}, D={D}; pad B/C to tileable "
            f"sizes or reduce block_b/block_c.")
    nb, nc = B // tb, C // tc

    # ---- one-time prep: normalize + cast (removes per-tile rsqrt work and
    # halves the streamed W bytes when matmul_dtype=bf16) --------------------
    xn = _l2_normalize(x).astype(mm_dtype)
    wn = _l2_normalize(weight).astype(mm_dtype)
    label_i32 = label.astype(jnp.int32)
    label2d = label_i32.reshape(B, 1)

    precision = (lax.Precision.HIGHEST if mm_dtype == jnp.dtype(jnp.float32)
                 else lax.Precision.DEFAULT)

    if fold:
        out_spec = pl.BlockSpec((tb, C), lambda bi, ci: (bi, 0))
    else:
        out_spec = pl.BlockSpec((tb, tc), lambda bi, ci: (bi, ci))

    out, margin = pl.pallas_call(
        functools.partial(_fml_kernel, float(s), tc, fold, precision),
        out_shape=(jax.ShapeDtypeStruct((B, C), out_dtype),
                   jax.ShapeDtypeStruct((B, 1), jnp.float32)),
        grid_spec=pltpu.PrefetchScalarGridSpec(
            num_scalar_prefetch=0,
            grid=(nb, nc),
            in_specs=[
                pl.BlockSpec((tb, D), lambda bi, ci: (bi, 0)),   # normalized x rows
                pl.BlockSpec((tc, D), lambda bi, ci: (ci, 0)),   # normalized W tile
                pl.BlockSpec((tb, 1), lambda bi, ci: (bi, 0)),   # labels
            ],
            out_specs=[
                out_spec,                                        # s*cos (- margin)
                pl.BlockSpec((tb, 1), lambda bi, ci: (bi, 0)),   # per-row margin
            ],
            scratch_shapes=[
                pltpu.VMEM((tb, 1), jnp.float32),   # running sum(exp(cosine))
                pltpu.VMEM((tb, 1), jnp.float32),   # cosine at the label column
            ],
        ),
        compiler_params=pltpu.CompilerParams(
            dimension_semantics=("parallel", "arbitrary"),
            vmem_limit_bytes=int(vmem_limit),
        ),
    )(xn, wn, label2d)

    if not fold:
        # Very large C: logits were emitted tiled; fix the single label column
        # per row with a tiny scatter (touches B elements, not B*C).
        out = out.at[jnp.arange(B), label_i32].add(
            (-margin[:, 0]).astype(out.dtype))
    return out


def _reference(x, weight, label, s=64.0, matmul_dtype=jnp.float32):
    xn = _l2_normalize(x).astype(matmul_dtype)
    wn = _l2_normalize(weight).astype(matmul_dtype)
    cosine = jnp.dot(xn, wn.T, preferred_element_type=jnp.float32,
                     precision=lax.Precision.HIGHEST)
    datap = jax.nn.softmax(cosine, axis=1)
    p_true = jnp.take_along_axis(datap, label[:, None].astype(jnp.int32), axis=1)
    one_hot = jnp.arange(cosine.shape[1])[None, :] == label[:, None]
    phi = cosine - 0.5 * jnp.exp(-p_true)
    return s * jnp.where(one_hot, phi, cosine)


if __name__ == "__main__":
    key = jax.random.PRNGKey(0)
    k_x, k_w, k_l = jax.random.split(key, 3)

    # Small but non-trivial: exercises a (4, 4) grid in the fused pass.
    B, D, C = 64, 128, 512
    s = 64.0

    x = jax.random.normal(k_x, (B, D), dtype=jnp.float32)
    bound = math.sqrt(6.0 / (C + D))            # xavier_uniform_ on (C, D)
    weight = jax.random.uniform(k_w, (C, D), minval=-bound, maxval=bound,
                                dtype=jnp.float32)
    label = jax.random.randint(k_l, (B,), 0, C, dtype=jnp.int32)

    # 1) f32 matmul path, margin folded in-kernel (single fused pass).
    out_f32 = jax.block_until_ready(
        fml_forward(x, weight, label, s=s, block_b=16, block_c=128,
                    matmul_dtype=jnp.float32))
    ref_f32 = _reference(x, weight, label, s=s, matmul_dtype=jnp.float32)
    assert out_f32.shape == (B, C)
    err = float(jnp.max(jnp.abs(out_f32 - ref_f32)))
    assert err < 2e-2, f"f32 path max abs err {err}"

    # 2) bf16-MXU path (production default), checked against a bf16-input ref.
    out_bf16 = jax.block_until_ready(
        fml_forward(x, weight, label, s=s, block_b=16, block_c=128,
                    matmul_dtype=jnp.bfloat16))
    ref_bf16 = _reference(x, weight, label, s=s, matmul_dtype=jnp.bfloat16)
    err_bf = float(jnp.max(jnp.abs(out_bf16 - ref_bf16)))
    assert err_bf < 5e-2, f"bf16 path max abs err {err_bf}"

    # 3) huge-C fallback (tiled logits + wrapper scatter for the label column).
    out_nf = jax.block_until_ready(
        fml_forward(x, weight, label, s=s, block_b=16, block_c=128,
                    matmul_dtype=jnp.float32, fold_margin=False))
    err_nf = float(jnp.max(jnp.abs(out_nf - ref_f32)))
    assert err_nf < 2e-2, f"no-fold path max abs err {err_nf}"

    print("KERNEL_OK")
</pallas_src>

<mosaic_0001>
module attributes {stable_mosaic.version = 11 : i64} {
  func.func @_fml_kernel(%arg0: i32, %arg1: i32, %arg2: memref<16x128xf32, #tpu.memory_space<vmem>>, %arg3: memref<128x128xf32, #tpu.memory_space<vmem>>, %arg4: memref<16x1xi32, #tpu.memory_space<vmem>>, %arg5: memref<16x512xf32, #tpu.memory_space<vmem>>, %arg6: memref<16x1xf32, #tpu.memory_space<vmem>>, %arg7: memref<16x1xf32, #tpu.memory_space<vmem>>, %arg8: memref<16x1xf32, #tpu.memory_space<vmem>>) attributes {dimension_semantics = [#tpu.dimension_semantics<parallel>, #tpu.dimension_semantics<arbitrary>], iteration_bounds = array<i64: 4, 4>, scalar_prefetch = 0 : i64, scratch_operands = 2 : i64, tpu.core_type = #tpu.core_type<tc>, window_params = [{transform_indices = @transform_0, window_bounds = array<i64: 16, 128>}, {transform_indices = @transform_1, window_bounds = array<i64: 128, 128>}, {transform_indices = @transform_2, window_bounds = array<i64: 16, 1>}, {transform_indices = @transform_3, window_bounds = array<i64: 16, 512>}, {transform_indices = @transform_4, window_bounds = array<i64: 16, 1>}]} {
    %c0_i32 = arith.constant 0 : i32
    %0 = arith.cmpi eq, %arg1, %c0_i32 : i32
    %1 = arith.extui %0 : i1 to i32
    %c0_i32_0 = arith.constant 0 : i32
    %2 = arith.cmpi ne, %1, %c0_i32_0 : i32
    scf.if %2 {
      %cst_21 = arith.constant 0.000000e+00 : f32
      %35 = vector.broadcast %cst_21 : f32 to vector<16x1xf32>
      %c0_22 = arith.constant 0 : index
      %c0_23 = arith.constant 0 : index
      %36 = vector.load %arg7[%c0_22, %c0_23] : memref<16x1xf32, #tpu.memory_space<vmem>>, vector<16x1xf32>
      tpu.vector_store %arg7[%c0_22, %c0_23], %35 {strides = array<i32>} : memref<16x1xf32, #tpu.memory_space<vmem>>, vector<16x1xf32>,
      %cst_24 = arith.constant 0.000000e+00 : f32
      %37 = vector.broadcast %cst_24 : f32 to vector<16x1xf32>
      %c0_25 = arith.constant 0 : index
      %c0_26 = arith.constant 0 : index
      %38 = vector.load %arg8[%c0_25, %c0_26] : memref<16x1xf32, #tpu.memory_space<vmem>>, vector<16x1xf32>
      tpu.vector_store %arg8[%c0_25, %c0_26], %37 {strides = array<i32>} : memref<16x1xf32, #tpu.memory_space<vmem>>, vector<16x1xf32>,
    } else {
    }
    %c0 = arith.constant 0 : index
    %c0_1 = arith.constant 0 : index
    %3 = vector.load %arg2[%c0, %c0_1] : memref<16x128xf32, #tpu.memory_space<vmem>>, vector<16x128xf32>
    %c0_2 = arith.constant 0 : index
    %c0_3 = arith.constant 0 : index
    %4 = vector.load %arg3[%c0_2, %c0_3] : memref<128x128xf32, #tpu.memory_space<vmem>>, vector<128x128xf32>
    %cst = arith.constant dense<0.000000e+00> : vector<16x128xf32>
    %5 = tpu.matmul %3, %4, %cst {dimension_numbers = #tpu.dot_dimension_numbers<[1], [1], [0], [0], [0, 0, 1, 0], [], []>, precision = #tpu.contract_precision<fp32>} : vector<16x128xf32>, vector<128x128xf32>, vector<16x128xf32> -> vector<16x128xf32>
    %cst_4 = arith.constant 6.400000e+01 : f32
    %6 = vector.broadcast %cst_4 : f32 to vector<16x128xf32>
    %7 = arith.mulf %6, %5 : vector<16x128xf32>
    %c128_i32 = arith.constant 128 : i32
    %8 = arith.muli %arg1, %c128_i32 : i32
    %9 = tpu.assume_multiple %8, 128 : i32
    %c0_5 = arith.constant 0 : index
    %10 = arith.index_cast %9 : i32 to index
    %11 = vector.load %arg5[%c0_5, %10] : memref<16x512xf32, #tpu.memory_space<vmem>>, vector<16x128xf32>
    tpu.vector_store %arg5[%c0_5, %10], %7 {strides = array<i32>} : memref<16x512xf32, #tpu.memory_space<vmem>>, vector<16x128xf32>,
    %c0_6 = arith.constant 0 : index
    %c0_7 = arith.constant 0 : index
    %12 = vector.load %arg7[%c0_6, %c0_7] : memref<16x1xf32, #tpu.memory_space<vmem>>, vector<16x1xf32>
    %13 = math.exp %5 : vector<16x128xf32>
    %cst_8 = arith.constant dense<0.000000e+00> : vector<16xf32>
    %14 = vector.multi_reduction <add>, %13, %cst_8 [1] : vector<16x128xf32> to vector<16xf32>
    %15 = vector.shape_cast %14 : vector<16xf32> to vector<16x1xf32>
    %16 = arith.addf %12, %15 : vector<16x1xf32>
    %c0_9 = arith.constant 0 : index
    %c0_10 = arith.constant 0 : index
    %17 = vector.load %arg7[%c0_9, %c0_10] : memref<16x1xf32, #tpu.memory_space<vmem>>, vector<16x1xf32>
    tpu.vector_store %arg7[%c0_9, %c0_10], %16 {strides = array<i32>} : memref<16x1xf32, #tpu.memory_space<vmem>>, vector<16x1xf32>,
    %c0_11 = arith.constant 0 : index
    %c0_12 = arith.constant 0 : index
    %18 = vector.load %arg4[%c0_11, %c0_12] : memref<16x1xi32, #tpu.memory_space<vmem>>, vector<16x1xi32>
    %19 = tpu.iota {dimensions = array<i32: 1>} : vector<16x128xi32>
    %c128_i32_13 = arith.constant 128 : i32
    %20 = arith.muli %arg1, %c128_i32_13 : i32
    %21 = vector.broadcast %20 : i32 to vector<16x128xi32>
    %22 = arith.addi %19, %21 : vector<16x128xi32>
    %23 = vector.broadcast %18 : vector<16x1xi32> to vector<16x128xi32>
    %24 = arith.cmpi eq, %22, %23 : vector<16x128xi32>
    %c0_14 = arith.constant 0 : index
    %c0_15 = arith.constant 0 : index
    %25 = vector.load %arg8[%c0_14, %c0_15] : memref<16x1xf32, #tpu.memory_space<vmem>>, vector<16x1xf32>
    %cst_16 = arith.constant 0.000000e+00 : f32
    %26 = vector.broadcast %cst_16 : f32 to vector<16x128xf32>
    %27 = arith.select %24, %5, %26 : vector<16x128xi1>, vector<16x128xf32>
    %cst_17 = arith.constant dense<0.000000e+00> : vector<16xf32>
    %28 = vector.multi_reduction <add>, %27, %cst_17 [1] : vector<16x128xf32> to vector<16xf32>
    %29 = vector.shape_cast %28 : vector<16xf32> to vector<16x1xf32>
    %30 = arith.addf %25, %29 : vector<16x1xf32>
    %c0_18 = arith.constant 0 : index
    %c0_19 = arith.constant 0 : index
    %31 = vector.load %arg8[%c0_18, %c0_19] : memref<16x1xf32, #tpu.memory_space<vmem>>, vector<16x1xf32>
    tpu.vector_store %arg8[%c0_18, %c0_19], %30 {strides = array<i32>} : memref<16x1xf32, #tpu.memory_space<vmem>>, vector<16x1xf32>,
    %c3_i32 = arith.constant 3 : i32
    %32 = arith.cmpi eq, %arg1, %c3_i32 : i32
    %33 = arith.extui %32 : i1 to i32
    %c0_i32_20 = arith.constant 0 : i32
    %34 = arith.cmpi ne, %33, %c0_i32_20 : i32
    scf.if %34 {
      %c0_21 = arith.constant 0 : index
      %c0_22 = arith.constant 0 : index
      %35 = vector.load %arg8[%c0_21, %c0_22] : memref<16x1xf32, #tpu.memory_space<vmem>>, vector<16x1xf32>
      %36 = math.exp %35 : vector<16x1xf32>
      %c0_23 = arith.constant 0 : index
      %c0_24 = arith.constant 0 : index
      %37 = vector.load %arg7[%c0_23, %c0_24] : memref<16x1xf32, #tpu.memory_space<vmem>>, vector<16x1xf32>
      %38 = arith.divf %36, %37 : vector<16x1xf32>
      %cst_25 = arith.constant 0.000000e+00 : f32
      %39 = vector.broadcast %cst_25 : f32 to vector<16x1xf32>
      %40 = arith.subf %39, %38 : vector<16x1xf32>
      %41 = math.exp %40 : vector<16x1xf32>
      %cst_26 = arith.constant 3.200000e+01 : f32
      %42 = vector.broadcast %cst_26 : f32 to vector<16x1xf32>
      %43 = arith.mulf %42, %41 : vector<16x1xf32>
      %c0_27 = arith.constant 0 : index
      %c0_28 = arith.constant 0 : index
      %44 = vector.load %arg6[%c0_27, %c0_28] : memref<16x1xf32, #tpu.memory_space<vmem>>, vector<16x1xf32>
      tpu.vector_store %arg6[%c0_27, %c0_28], %43 {strides = array<i32>} : memref<16x1xf32, #tpu.memory_space<vmem>>, vector<16x1xf32>,
      %45 = tpu.iota {dimensions = array<i32: 1>} : vector<16x512xi32>
      %46 = vector.broadcast %18 : vector<16x1xi32> to vector<16x512xi32>
      %47 = arith.cmpi eq, %45, %46 : vector<16x512xi32>
      %c0_29 = arith.constant 0 : index
      %c0_30 = arith.constant 0 : index
      %48 = vector.load %arg5[%c0_29, %c0_30] : memref<16x512xf32, #tpu.memory_space<vmem>>, vector<16x512xf32>
      %cst_31 = arith.constant 0.000000e+00 : f32
      %49 = vector.shape_cast %43 : vector<16x1xf32> to vector<16x1xf32>
      %50 = vector.broadcast %49 : vector<16x1xf32> to vector<16x512xf32>
      %51 = vector.broadcast %cst_31 : f32 to vector<16x512xf32>
      %52 = arith.select %47, %50, %51 : vector<16x512xi1>, vector<16x512xf32>
      %53 = arith.subf %48, %52 : vector<16x512xf32>
      %c0_32 = arith.constant 0 : index
      %c0_33 = arith.constant 0 : index
      %54 = vector.load %arg5[%c0_32, %c0_33] : memref<16x512xf32, #tpu.memory_space<vmem>>, vector<16x512xf32>
      tpu.vector_store %arg5[%c0_32, %c0_33], %53 {strides = array<i32>} : memref<16x512xf32, #tpu.memory_space<vmem>>, vector<16x512xf32>,
    } else {
    }
    return
  }
  func.func @transform_0(%arg0: i32, %arg1: i32) -> (i32, i32) {
    %c0_i32 = arith.constant 0 : i32
    %c0_i32_0 = arith.constant 0 : i32
    return %arg0, %c0_i32 : i32, i32
  }
  func.func @transform_1(%arg0: i32, %arg1: i32) -> (i32, i32) {
    %c0_i32 = arith.constant 0 : i32
    %c0_i32_0 = arith.constant 0 : i32
    return %arg1, %c0_i32 : i32, i32
  }
  func.func @transform_2(%arg0: i32, %arg1: i32) -> (i32, i32) {
    %c0_i32 = arith.constant 0 : i32
    %c0_i32_0 = arith.constant 0 : i32
    return %arg0, %c0_i32 : i32, i32
  }
  func.func @transform_3(%arg0: i32, %arg1: i32) -> (i32, i32) {
    %c0_i32 = arith.constant 0 : i32
    %c0_i32_0 = arith.constant 0 : i32
    return %arg0, %c0_i32 : i32, i32
  }
  func.func @transform_4(%arg0: i32, %arg1: i32) -> (i32, i32) {
    %c0_i32 = arith.constant 0 : i32
    %c0_i32_0 = arith.constant 0 : i32
    return %arg0, %c0_i32 : i32, i32
  }
}

</mosaic_0001>

<bundles_post_ra>
// kernel: tpu_custom_call.1
= control target key start
LH: loop header
LB: loop body
LE: loop exit
PB: predicated region body
PF: predicated region fallthrough
CT: control target
= control target key end

     0   :  { %10 = vsyncpa [#allocation5], 0  ;;  %s2589_s0 = inlined_call_operand.vmem [shape: f32[64,128], index: 0, kind: input, shape index: {}]   ;;  %s2590_s1 = inlined_call_operand.hbm [shape: f32[512,128], index: 1, kind: input, shape index: {}]   ;;  %s2591_s2 = inlined_call_operand.vmem [shape: s32[64,1], index: 2, kind: input, shape index: {}]   ;;  %s2592_s3 = inlined_call_operand.hbm [shape: f32[64,512], index: 3, kind: output, shape index: {0}]   ;;  %s2593_s4 = inlined_call_operand.vmem [shape: f32[64,1], index: 4, kind: output, shape index: {1}]  }
   0x1   :  { %12 = vsyncpa [#allocation5 + $0x1], 0 }
   0x2   :  { %13 = vsyncpa [#allocation6], 0 }
   0x3   :  { %15 = vsyncpa [#allocation6 + $0x1], 0  ;;  %s1945_s15 = smov 0   ;;  %s1947_s16 = smov 0  }
   0x4   :  { %s1949_s17 = smov 0   ;;  %s1951_s18 = smov 0  }
   0x5   :  { %s1953_s19 = smov 0   ;;  %s1955_s20 = smov 0  }
   0x6   :  { %s1957_s21 = smov 0   ;;  %s1959_s22 = smov 0  }
   0x7   :  { %s1961_s23 = smov 0   ;;  %s1963_s24 = smov 0  }
   0x8   :  { %s1965_s25 = smov 0  }
   0x9 LB: > { %2598 = sst [smem:[#allocation10_spill]] %s1901_s23  ;;  %s1287_s26 = sadd.s32 4294967295, %s1909_s25   ;;  %s1909_s25 = sphi %s1965_s25, %s21_s25   ;;  %s1905_s24 = sphi %s1963_s24, %s2612_s24   ;;  %s1901_s23 = sphi %s1961_s23, %s2611_s23   ;;  %s1897_s22 = sphi %s1959_s22, %s2610_s22   ;;  %s1893_s21 = sphi %s1957_s21, %s2609_s21   ;;  %s1889_s20 = sphi %s1955_s20, %s2618_s20   ;;  %s1885_s19 = sphi %s1953_s19, %s2617_s19   ;;  %s1881_s18 = sphi %s1951_s18, %s2616_s18   ;;  %s1877_s17 = sphi %s1949_s17, %s2615_s17   ;;  %s1873_s16 = sphi %s1947_s16, %s2614_s16   ;;  %s1869_s15 = sphi %s1945_s15, %s2613_s15  }
   0xa   : > { %2599 = sst [smem:[#allocation11_spill]] %s1905_s24  ;;  %s1288_s27 = sadd.s32 4294967294, %s1909_s25  }
   0xb   : > { %s30_s28 = sadd.s32 1, %s1901_s23  ;;  %s33_s29 = sadd.s32 1, %s1905_s24 }
   0xc   : > { %p31_p0 = scmp.ge.s32.totalorder %s30_s28, 4  ;;  %s66_s30 = sadd.s32 1, %s1889_s20 }
   0xd   : > { %p73_p1 = scmp.ne.s32.totalorder %s1889_s20, %s1885_s19  ;;  %p74_p2 = scmp.eq.s32.totalorder %s1909_s25, 0 }
   0xe   : > { %s2620_s28 = smov (%p31_p0, %s30_s28), 0  ;;  %s2622_s29 = smov (!%p31_p0, %s33_s29), %s1905_s24 }
   0xf   : > { %2600 = sst [smem:[#allocation12_spill]] %s2620_s28  ;;  %s63_s5 = ssub.s32 %s1901_s23, %s2620_s28 }
  0x10   : > { %p2011_p3 = por %p74_p2, %p73_p1  ;;  %p35_p4 = scmp.ge.s32.totalorder %s2622_s29, 4 }
  0x11   : > { %p64_p5 = scmp.eq.s32.totalorder %s63_s5, 0  ;;  %p79_p6 = scmp.ne.s32.totalorder %s1885_s19, %s1881_s18 }
  0x12   : > { %p80_p7 = scmp.eq.s32.totalorder %s1287_s26, 0  ;;  %s2624_s29 = smov (%p35_p4, %s2622_s29), 0 }
  0x13   : > { %2602 = sst [smem:[#allocation13_spill]] %s2624_s29  ;;  %s115_s9 = ssub.s32 %s1905_s24, %s2624_s29 }
  0x14   : > { %s2019_s7 = scalar_select %p64_p5, %s1889_s20, %s66_s30  }
  0x15   : > { %p2021_p8 = por %p80_p7, %p79_p6  ;;  %p116_p9 = scmp.eq.s32.totalorder %s115_s9, 0 }
  0x16   : > { %2603 = sst [smem:[#allocation14_spill]] %s2019_s7  ;;  %s118_s10 = sadd.s32 1, %s1877_s17 }
  0x17   : > { %p128_p10 = scmp.ne.s32.totalorder %s1877_s17, %s1873_s16  ;;  %p129_p11 = scmp.eq.s32.totalorder %s1287_s26, 15 }
  0x18   : > { %s2031_s11 = scalar_select %p116_p9, %s1877_s17, %s118_s10  }
  0x19   : > { %p2033_p12 = por %p129_p11, %p128_p10  ;;  %p134_p13 = scmp.ne.s32.totalorder %s1873_s16, %s1869_s15 }
  0x1a   : > { %p135_p0 = scmp.eq.s32.totalorder %s1288_s27, 15  ;;  %p1646_p1 = scmp.lt.s32.totalorder %s1909_s25, 16 }
  0x1b   : > { %s190_s13 = sand.u32 1, %s1889_s20   ;;  %s1313_s30 = sshll.u32 %s1901_s23, 11 }
  0x1c   : > { %p2041_p2 = por %p135_p0, %p134_p13  ;;  %s1291_s18 = sshll.u32 %s190_s13, 7 }
  0x1d   : > { %s200_s26 = scalar_lea.hbm %s2590_s1, %s1313_s30  ;;  %s194_s10 = scalar_lea.vmem [#allocation4], %s1291_s18 }
  0x1e   : > { %s201_s29 = sshll.u32 %s194_s10, 4  ;;  %p2051_p4 = pnand %p1646_p1, %p2011_p3  ;;  %s202_s29 = int_to_ptr.vmem [resolvable:$true] %s201_s29 }
  0x1f   : > { %s191_s27 = scalar_lea.sflag [#allocation5], %s190_s13  ;;  %s1774_s24 = scalar_lea.vmem %s202_s29, 2048 }
  0x20   : > { %p1763_p5 = pneg %p2051_p4  ;;  %p1775_p6 = scmp.ne.s32.totalorder %s202_s29, %s1774_s24 }
  0x21   : > { %s1911_s23 = smov [#allocation4]  }
  0x22   : > { %p1777_p7 = pnand %p1775_p6, %p1763_p5  ;;  %s1779_s7 = sshll.u32 %s1911_s23, 4  ;;  %s1780_s7 = int_to_ptr.vmem [resolvable:$false] %s1779_s7 }
  0x23   : > { %s1781_s30 = scalar_lea.vmem %s1780_s7, 4096  ;;  %p1782_p10 = scmp.lt.s32.totalorder %s202_s29, %s1780_s7 }
  0x24   : > { %p1778_p9 = pneg %p1777_p7  ;;  %p1783_p11 = scmp.lt.s32.totalorder %s1781_s30, %s1774_s24 }
  0x26   : > { %p1784_p13 = por %p1783_p11, %p1782_p10 }
  0x28   : > { %p1785_p3 = pnand %p1784_p13, %p1778_p9 }
  0x2a   : > { %1788 = shalt.err (!%p1785_p3)
}
  0x2b   : > { %s1912_s6 = smov 128   ;;  %s1913_s13 = smov 8  }
  0x2c   : > { %1641 = dma.hbm_to_vmem [thread:$0]  (!%p2051_p4), %s200_s26, 2048, %s202_s29, %s191_s27, %s1912_s6, %s1912_s6, %s1913_s13  }
  0x2d   : > { %p1294_p0 = scmp.ge.s32.totalorder %s1909_s25, 1  ;;  %p218_p1 = scmp.lt.s32.totalorder %s1909_s25, 17 }
  0x2f   : > { %p219_p5 = pnand %p1294_p0, %p218_p1 }
  0x30   : > { %s224_s23 = sand.u32 (!%p219_p5), 1, %s1885_s19  }
  0x31   : > { %222 = sbr.rel (%p219_p5) target bundleno = 828 (0x33c), region = 32  ;;  %s1295_s18 = sshll.u32 (!%p219_p5), %s224_s23, 7 }
  0x32   : > { %s225_s7 = scalar_lea.sflag (!%p219_p5), [#allocation5], %s224_s23  ;;  %s2062_s24 = scalar_lea.vmem (!%p219_p5), [#allocation4], %s1295_s18 }
  0x36   : > { %1860 = dma.done.wait (%p2021_p8), %s225_s7, 2048  }
  0x37   : > { %1862 = vsyncadd (%p2021_p8), %s225_s7, 4294965248  ;;  %s258_s28 = sand.u32 1, %s1873_s16   ;;  %s1297_s29 = sshll.u32 %s1897_s22, 1 }
  0x38   : > { %s1296_s5 = sshll.u32 %s258_s28, 6  ;;  %p269_p4 = scmp.lt.s32.totalorder %s1297_s29, 7 }
  0x39   : > { %s2087_s7 = scalar_lea.vmem [#allocation7], %s1296_s5  ;;  %p1303_p8 = scmp.ne.s32.totalorder %s1893_s21, 0 }
  0x3a   : > { %s2626_s29 = smov (!%p269_p4, %s1297_s29), 7 }
  0x3b   : > { %s1298_s9 = sshll.u32 %s2626_s29, 3  ;;  %291 = sbr.rel (%p1303_p8) target bundleno = 67 (0x43), region = 40 }
  0x3c   : > { %s2075_s27 = scalar_lea.vmem %s2589_s0, %s1298_s9  ;;  %s2080_s8 = scalar_lea.vmem %s2591_s2, %s1298_s9 }
  0x3d   : > { %s2085_s18 = scalar_lea.vmem %s2593_s4, %s1298_s9 }
  0x40   : > { %vm292_vm0 = vcmask 7168   ;;  %v1914_v0 = vmov 0.0  }
  0x41   : > { %293 = vst.msk [vmem:[#allocation2] sm:$0xff] %vm292_vm0, %v1914_v0  ;;  %294 = vst.msk [vmem:[#allocation2 + $0x8] sm:$0xff] %vm292_vm0, %v1914_v0 }
  0x42   : > { %295 = vst.msk [vmem:[#allocation3] sm:$0xff] %vm292_vm0, %v1914_v0  ;;  %296 = vst.msk [vmem:[#allocation3 + $0x8] sm:$0xff] %vm292_vm0, %v1914_v0 }
  0x43 PF: > { %v314_v1 = vld [vmem:[%s2062_s24 + $0x78] sm:$0xff]  ;;  %v313_v2 = vld [vmem:[%s2062_s24 + $0x70] sm:$0xff]  ;;  %v312_v3 = vld [vmem:[%s2062_s24 + $0x68] sm:$0xff]  ;;  %vm1020_vm3 = vcmask 7168   ;;  %p1306_p6 = scmp.ne.s32.totalorder %s1893_s21, 3 }
  0x44   : > { %v2093_v4 = vand.u32 4294901760, %v314_v1  ;;  %v2095_v5 = vand.u32 4294901760, %v313_v2  ;;  %v2097_v6 = vand.u32 4294901760, %v312_v3  ;;  %v311_v7 = vld [vmem:[%s2062_s24 + $0x60] sm:$0xff]  ;;  %v310_v8 = vld [vmem:[%s2062_s24 + $0x58] sm:$0xff]  ;;  %v309_v17 = vld [vmem:[%s2062_s24 + $0x50] sm:$0xff] }
  0x45   : > { %v2101_v9 = vand.u32 4294901760, %v311_v7  ;;  %v2114_v13 = vand.u32 4294901760, %v310_v8  ;;  %v2135_v21 = vand.u32 4294901760, %v309_v17  ;;  %v308_v27 = vld [vmem:[%s2062_s24 + $0x48] sm:$0xff]  ;;  %v307_v32 = vld [vmem:[%s2062_s24 + $0x40] sm:$0xff]  ;;  %v306_v40 = vld [vmem:[%s2062_s24 + $0x38] sm:$0xff] }
  0x46   : > { %1424 = vmatprep.subr.mxu0 %v2093_v4  ;;  %v2105_v10 = vsub.f32 %v314_v1, %v2093_v4  ;;  %v2108_v11 = vsub.f32 %v313_v2, %v2095_v5  ;;  %v2111_v12 = vsub.f32 %v312_v3, %v2097_v6  ;;  %v2148_v28 = vand.u32 4294901760, %v308_v27  ;;  %v297_v34 = vld [vmem:[%s2075_s27] sm:$0xff]  ;;  %v305_v48 = vld [vmem:[%s2062_s24 + $0x30] sm:$0xff]  ;;  %v304_v56 = vld [vmem:[%s2062_s24 + $0x28] sm:$0xff] }
  0x47   : > { %1425 = vmatpush3.xpose.msra.mxu0 %v2093_v4  ;;  %v2128_v18 = vsub.f32 %v311_v7, %v2101_v9  ;;  %v2138_v22 = vsub.f32 %v310_v8, %v2114_v13  ;;  %v2158_v33 = vsub.f32 %v309_v17, %v2135_v21  ;;  %v2162_v35 = vand.u32 4294901760, %v307_v32  ;;  %v303_v62 = vld [vmem:[%s2062_s24 + $0x20] sm:$0xff]  ;;  %v302_v7 = vld [vmem:[%s2062_s24 + $0x18] sm:$0xff] }
  0x48   : > { %1426 = vmatprep.subr.mxu0 %v2095_v5  ;;  %v2118_v14 = vand.u32 4294901760, %v2105_v10  ;;  %v2121_v15 = vand.u32 4294901760, %v2108_v11  ;;  %v2124_v16 = vand.u32 4294901760, %v2111_v12  ;;  %v2164_v36 = vand.u32 4294901760, %v297_v34 }
  0x49   : > { %v2144_v26 = vand.u32 4294901760, %v2128_v18  ;;  %v2154_v31 = vand.u32 4294901760, %v2138_v22  ;;  %v2170_v39 = vand.u32 4294901760, %v2158_v33  ;;  %v2174_v41 = vsub.f32 %v308_v27, %v2148_v28 }
  0x4a   : > { %v420_v19 = vsub.f32 %v2105_v10, %v2118_v14  ;;  %v427_v20 = vsub.f32 %v2108_v11, %v2121_v15  ;;  %v434_v25 = vsub.f32 %v2111_v12, %v2124_v16  ;;  %v2177_v42 = vsub.f32 %v297_v34, %v2164_v36  ;;  %1491 = vmatprep.mubr.f32.mxu1 %v2164_v36  ;;  %v300_v34 = vld [vmem:[%s2062_s24 + $0x8] sm:$0xff] }
  0x4b   : > { %1427 = vmatpush3.xpose.msra.mxu0 %v2095_v5  ;;  %v441_v30 = vsub.f32 %v2128_v18, %v2144_v26  ;;  %v448_v38 = vsub.f32 %v2138_v22, %v2154_v31  ;;  %v2181_v43 = vand.u32 4294901760, %v306_v40  ;;  %v455_v46 = vsub.f32 %v2158_v33, %v2170_v39 }
  0x4c   : > { %1428 = vmatprep.subr.mxu0 %v2097_v6  ;;  %v421_v23 = vand.u32 4294901760, %v420_v19  ;;  %v428_v24 = vand.u32 4294901760, %v427_v20  ;;  %v435_v29 = vand.u32 4294901760, %v434_v25  ;;  %v398_v44 = vand.u32 4294901760, %v2177_v42 }
  0x4d   : > { %v442_v37 = vand.u32 4294901760, %v441_v30  ;;  %v449_v45 = vand.u32 4294901760, %v448_v38  ;;  %v2188_v47 = vand.u32 4294901760, %v2174_v41  ;;  %v2192_v49 = vsub.f32 %v307_v32, %v2162_v35 }
  0x4e   : > { %1459 = vmatprep.subr.mxu1 %v421_v23  ;;  %v399_v50 = vsub.f32 %v2177_v42, %v398_v44  ;;  %v2198_v51 = vand.u32 4294901760, %v305_v48  ;;  %v456_v53 = vand.u32 4294901760, %v455_v46  ;;  %v2208_v57 = vsub.f32 %v306_v40, %v2181_v43  ;;  %v298_v40 = vld [vmem:[%s2075_s27 + $0x8] sm:$0xff] }
  0x4f   : > { %1429 = vmatpush3.xpose.msra.mxu0 %v2097_v6  ;;  %1460 = vmatpush3.xpose.msra.mxu1 %v421_v23  ;;  %v462_v54 = vsub.f32 %v2174_v41, %v2188_v47  ;;  %v2204_v55 = vand.u32 4294901760, %v2192_v49  ;;  %v2211_v58 = vand.u32 4294901760, %v304_v56  ;;  %v2224_v0 = vand.u32 4294901760, %v303_v62 }
  0x50   : > { %1430 = vmatprep.subr.mxu0 %v2101_v9  ;;  %1461 = vmatprep.subr.mxu1 %v428_v24  ;;  %v400_v52 = vand.u32 4294901760, %v399_v50  ;;  %v2217_v61 = vand.u32 4294901760, %v2208_v57  ;;  %v2221_v63 = vsub.f32 %v305_v48, %v2198_v51  ;;  %v2237_v17 = vand.u32 4294901760, %v302_v7  ;;  %v299_v50 = vld [vmem:[%s2062_s24] sm:$0xff] }
  0x51   : > { %v463_v59 = vand.u32 4294901760, %v462_v54  ;;  %v469_v60 = vsub.f32 %v2192_v49, %v2204_v55  ;;  %v2234_v8 = vsub.f32 %v304_v56, %v2211_v58  ;;  %v2247_v25 = vsub.f32 %v303_v62, %v2224_v0 }
  0x52   : > { %1456 = vmatprep.mubr.f32.mxu0 %v400_v52  ;;  %v476_v2 = vsub.f32 %v2208_v57, %v2217_v61  ;;  %v2230_v3 = vand.u32 4294901760, %v2221_v63  ;;  %v2263_v38 = vand.u32 4294901760, %v300_v34  ;;  %v2279_v54 = vand.u32 4294901760, %v299_v50 }
  0x53   : > { %1431 = vmatpush3.xpose.msra.mxu0 %v2101_v9  ;;  %1462 = vmatpush3.xpose.msra.mxu1 %v428_v24  ;;  %v470_v1 = vand.u32 4294901760, %v469_v60  ;;  %v2243_v23 = vand.u32 4294901760, %v2234_v8  ;;  %v301_v24 = vld [vmem:[%s2062_s24 + $0x10] sm:$0xff]  ;;  %v2256_v32 = vand.u32 4294901760, %v2247_v25  ;;  %s1304_s24 = sshll.u32 %s1893_s21, 7 }
  0x54   : > { %1432 = vmatprep.subr.mxu0 %v2114_v13  ;;  %1463 = vmatprep.subr.mxu1 %v435_v29  ;;  %v477_v19 = vand.u32 4294901760, %v476_v2  ;;  %v483_v20 = vsub.f32 %v2221_v63, %v2230_v3  ;;  %v2250_v27 = vand.u32 4294901760, %v301_v24  ;;  %v2288_v62 = vsub.f32 %v300_v34, %v2263_v38  ;;  %s1002_s29 = sshra.s32 %s1304_s24, 7 }
  0x55   : > { %v490_v30 = vsub.f32 %v2234_v8, %v2243_v23  ;;  %v497_v46 = vsub.f32 %v2247_v25, %v2256_v32  ;;  %s1305_s5 = sshll.u32 %s1002_s29, 3 }
  0x56   : > { %v2274_v52 = vsub.f32 %v301_v24, %v2250_v27  ;;  %s1005_s9 = scalar_lea.vmem %s2087_s7, %s1305_s5 [#allocation7] }
  0x57   : > { %1433 = vmatpush3.xpose.msra.mxu0 %v2114_v13  ;;  %1464 = vmatpush3.xpose.msra.mxu1 %v435_v29  ;;  %v484_v29 = vand.u32 4294901760, %v483_v20  ;;  %v498_v56 = vand.u32 4294901760, %v497_v46  ;;  %v2301_v20 = vsub.f32 %v299_v50, %v2279_v54 }
  0x58   : > { %1434 = vmatprep.subr.mxu0 %v2135_v21  ;;  %1465 = vmatprep.subr.mxu1 %v442_v37  ;;  %v2285_v60 = vand.u32 4294901760, %v2274_v52 }
  0x59   : > { %v2309_v34 = vand.u32 4294901760, %v2301_v20 }
  0x5b   : > { %1435 = vmatpush3.xpose.msra.mxu0 %v2135_v21  ;;  %1466 = vmatpush3.xpose.msra.mxu1 %v442_v37  ;;  %v2260_v37 = vsub.f32 %v302_v7, %v2237_v17  ;;  %v511_v7 = vsub.f32 %v2274_v52, %v2285_v60  ;;  %v525_v46 = vsub.f32 %v2301_v20, %v2309_v34 }
  0x5c   : > { %1436 = vmatprep.subr.mxu0 %v2148_v28  ;;  %1467 = vmatprep.subr.mxu1 %v449_v45 }
  0x5d   : > { %v2270_v48 = vand.u32 4294901760, %v2260_v37 }
  0x5f   : > { %1437 = vmatpush3.xpose.msra.mxu0 %v2148_v28  ;;  %1468 = vmatpush3.xpose.msra.mxu1 %v449_v45  ;;  %v491_v45 = vand.u32 4294901760, %v490_v30 }
  0x60   : > { %1438 = vmatprep.subr.mxu0 %v2162_v35  ;;  %1469 = vmatprep.subr.mxu1 %v456_v53 }
  0x63   : > { %1439 = vmatpush3.xpose.msra.mxu0 %v2162_v35  ;;  %1470 = vmatpush3.xpose.msra.mxu1 %v456_v53  ;;  %v2276_v53 = vand.u32 4294901760, %v298_v40 }
  0x64   : > { %1440 = vmatprep.subr.mxu0 %v2181_v43  ;;  %1471 = vmatprep.subr.mxu1 %v463_v59 }
  0x67   : > { %1441 = vmatpush3.xpose.msra.mxu0 %v2181_v43  ;;  %1472 = vmatpush3.xpose.msra.mxu1 %v463_v59  ;;  %v504_v59 = vsub.f32 %v2260_v37, %v2270_v48 }
  0x68   : > { %1442 = vmatprep.subr.mxu0 %v2198_v51  ;;  %1473 = vmatprep.subr.mxu1 %v470_v1 }
  0x69   : > { %v505_v2 = vand.u32 4294901760, %v504_v59 }
  0x6b   : > { %1443 = vmatpush3.xpose.msra.mxu0 %v2198_v51  ;;  %1474 = vmatpush3.xpose.msra.mxu1 %v470_v1  ;;  %v2291_v1 = vsub.f32 %v298_v40, %v2276_v53 }
  0x6c   : > { %1444 = vmatprep.subr.mxu0 %v2211_v58  ;;  %1475 = vmatprep.subr.mxu1 %v477_v19 }
  0x6d   : > { %v408_v24 = vand.u32 4294901760, %v2291_v1 }
  0x6f   : > { %1445 = vmatpush3.xpose.msra.mxu0 %v2211_v58  ;;  %1476 = vmatpush3.xpose.msra.mxu1 %v477_v19  ;;  %v2298_v19 = vand.u32 4294901760, %v2288_v62  ;;  %v409_v40 = vsub.f32 %v2291_v1, %v408_v24 }
  0x70   : > { %1446 = vmatprep.subr.mxu0 %v2224_v0  ;;  %1477 = vmatprep.subr.mxu1 %v484_v29 }
  0x71   : > { %v518_v30 = vsub.f32 %v2288_v62, %v2298_v19  ;;  %v410_v50 = vand.u32 4294901760, %v409_v40 }
  0x73   : > { %1447 = vmatpush3.xpose.msra.mxu0 %v2224_v0  ;;  %1478 = vmatpush3.xpose.msra.mxu1 %v484_v29  ;;  %v512_v29 = vand.u32 4294901760, %v511_v7 }
  0x74   : > { %1448 = vmatprep.subr.mxu0 %v2237_v17  ;;  %1479 = vmatprep.subr.mxu1 %v491_v45 }
  0x77   : > { %1449 = vmatpush3.xpose.msra.mxu0 %v2237_v17  ;;  %1480 = vmatpush3.xpose.msra.mxu1 %v491_v45  ;;  %v519_v45 = vand.u32 4294901760, %v518_v30 }
  0x78   : > { %1450 = vmatprep.subr.mxu0 %v2250_v27  ;;  %1481 = vmatprep.subr.mxu1 %v498_v56 }
  0x7b   : > { %1451 = vmatpush3.xpose.msra.mxu0 %v2250_v27  ;;  %1482 = vmatpush3.xpose.msra.mxu1 %v498_v56  ;;  %v526_v56 = vand.u32 4294901760, %v525_v46 }
  0x7c   : > { %1452 = vmatprep.subr.mxu0 %v2263_v38  ;;  %1483 = vmatprep.subr.mxu1 %v505_v2 }
  0x7f   : > { %1453 = vmatpush3.xpose.msra.mxu0 %v2263_v38  ;;  %1484 = vmatpush3.xpose.msra.mxu1 %v505_v2 }
  0x80   : > { %1454 = vmatprep.subr.mxu0 %v2279_v54  ;;  %1485 = vmatprep.subr.mxu1 %v512_v29 }
  0x83   : > { %1455 = vmatpush3.xpose.msra.mxu0 %v2279_v54  ;;  %1486 = vmatpush3.xpose.msra.mxu1 %v512_v29 }
  0x84   : > { %1487 = vmatprep.subr.mxu1 %v519_v45  ;;  %1494 = vmatprep.subr.mxu0 %v2105_v10 }
  0x86   : > { %1457 = vmatmul.mubr.f32.vlgmr.msra.gmra.mxu0 %v410_v50 }
  0x87   : > { %1488 = vmatpush3.xpose.msra.mxu1 %v519_v45  ;;  %1495 = vmatpush3.xpose.msra.mxu0 %v2105_v10  ;;  %v1023_v10 = vld [vmem:[%s2080_s8] sm:$0xff] }
  0x88   : > { %1489 = vmatprep.subr.mxu1 %v526_v56  ;;  %1496 = vmatprep.subr.mxu0 %v2108_v11 }
  0x89   : > { %1526 = vmatprep.mubr.f32.mxu0 %v2177_v42 }
  0x8b   : > { %1490 = vmatpush3.xpose.msra.mxu1 %v526_v56  ;;  %1497 = vmatpush3.xpose.msra.mxu0 %v2108_v11  ;;  %v1915_v11 = vmov 0  }
  0x8c   : > { %1498 = vmatprep.subr.mxu0 %v2111_v12  ;;  %1529 = vmatprep.subr.mxu1 %v2093_v4 }
  0x8d   : > { %1743 = vset.pattern.permute.xlu0 %v1915_v11 }
  0x8e   : > { %1492 = vmatmul.mubr.f32.vlgmr.msra.gmra.mxu1 %v2276_v53  ;;  %1030 = vperm.xlu0 %1743, %v1023_v10  }
  0x8f   : > { %1499 = vmatpush3.xpose.msra.mxu0 %v2111_v12  ;;  %1530 = vmatpush3.xpose.msra.mxu1 %v2093_v4  ;;  %v1024_v12 = vld [vmem:[%s2080_s8 + $0x8] sm:$0xff] }
  0x90   : > { %1500 = vmatprep.subr.mxu0 %v2128_v18  ;;  %1531 = vmatprep.subr.mxu1 %v2095_v5 }
  0x91   : > { %1561 = vmatprep.mubr.f32.mxu1 %v398_v44 }
  0x92   : > { %1033 = vperm.xlu0 %1743, %v1024_v12  }
  0x93   : > { %1501 = vmatpush3.xpose.msra.mxu0 %v2128_v18  ;;  %1532 = vmatpush3.xpose.msra.mxu1 %v2095_v5 }
  0x94   : > { %1502 = vmatprep.subr.mxu0 %v2138_v22  ;;  %1533 = vmatprep.subr.mxu1 %v2097_v6 }
  0x97   : > { %1503 = vmatpush3.xpose.msra.mxu0 %v2138_v22  ;;  %1534 = vmatpush3.xpose.msra.mxu1 %v2097_v6 }
  0x98   : > { %1504 = vmatprep.subr.mxu0 %v2158_v33  ;;  %1535 = vmatprep.subr.mxu1 %v2101_v9 }
  0x9b   : > { %1505 = vmatpush3.xpose.msra.mxu0 %v2158_v33  ;;  %1536 = vmatpush3.xpose.msra.mxu1 %v2101_v9 }
  0x9c   : > { %1506 = vmatprep.subr.mxu0 %v2174_v41  ;;  %1537 = vmatprep.subr.mxu1 %v2114_v13 }
  0x9f   : > { %1507 = vmatpush3.xpose.msra.mxu0 %v2174_v41  ;;  %1538 = vmatpush3.xpose.msra.mxu1 %v2114_v13 }
  0xa0   : > { %1508 = vmatprep.subr.mxu0 %v2192_v49  ;;  %1539 = vmatprep.subr.mxu1 %v2135_v21 }
  0xa3   : > { %1509 = vmatpush3.xpose.msra.mxu0 %v2192_v49  ;;  %1540 = vmatpush3.xpose.msra.mxu1 %v2135_v21 }
  0xa4   : > { %1510 = vmatprep.subr.mxu0 %v2208_v57  ;;  %1541 = vmatprep.subr.mxu1 %v2148_v28 }
  0xa7   : > { %1511 = vmatpush3.xpose.msra.mxu0 %v2208_v57  ;;  %1542 = vmatpush3.xpose.msra.mxu1 %v2148_v28 }
  0xa8   : > { %1512 = vmatprep.subr.mxu0 %v2221_v63  ;;  %1543 = vmatprep.subr.mxu1 %v2162_v35 }
  0xab   : > { %1513 = vmatpush3.xpose.msra.mxu0 %v2221_v63  ;;  %1544 = vmatpush3.xpose.msra.mxu1 %v2162_v35 }
  0xac   : > { %1514 = vmatprep.subr.mxu0 %v2234_v8  ;;  %1545 = vmatprep.subr.mxu1 %v2181_v43 }
  0xaf   : > { %1515 = vmatpush3.xpose.msra.mxu0 %v2234_v8  ;;  %1546 = vmatpush3.xpose.msra.mxu1 %v2181_v43 }
  0xb0   : > { %1516 = vmatprep.subr.mxu0 %v2247_v25  ;;  %1547 = vmatprep.subr.mxu1 %v2198_v51 }
  0xb3   : > { %1517 = vmatpush3.xpose.msra.mxu0 %v2247_v25  ;;  %1548 = vmatpush3.xpose.msra.mxu1 %v2198_v51 }
  0xb4   : > { %1518 = vmatprep.subr.mxu0 %v2260_v37  ;;  %1549 = vmatprep.subr.mxu1 %v2211_v58 }
  0xb7   : > { %1519 = vmatpush3.xpose.msra.mxu0 %v2260_v37  ;;  %1550 = vmatpush3.xpose.msra.mxu1 %v2211_v58 }
  0xb8   : > { %1520 = vmatprep.subr.mxu0 %v2274_v52  ;;  %1551 = vmatprep.subr.mxu1 %v2224_v0 }
  0xbb   : > { %1521 = vmatpush3.xpose.msra.mxu0 %v2274_v52  ;;  %1552 = vmatpush3.xpose.msra.mxu1 %v2224_v0 }
  0xbc   : > { %1522 = vmatprep.subr.mxu0 %v2288_v62  ;;  %1553 = vmatprep.subr.mxu1 %v2237_v17 }
  0xbf   : > { %1523 = vmatpush3.xpose.msra.mxu0 %v2288_v62  ;;  %1554 = vmatpush3.xpose.msra.mxu1 %v2237_v17 }
  0xc0   : > { %1524 = vmatprep.subr.mxu0 %v2301_v20  ;;  %1555 = vmatprep.subr.mxu1 %v2250_v27 }
  0xc3   : > { %1525 = vmatpush3.xpose.msra.mxu0 %v2301_v20  ;;  %1556 = vmatpush3.xpose.msra.mxu1 %v2250_v27 }
  0xc4   : > { %1557 = vmatprep.subr.mxu1 %v2263_v38  ;;  %1564 = vmatprep.subr.mxu0 %v2118_v14 }
  0xc6   : > { %1527 = vmatmul.mubr.f32.vlgmr.msra.gmra.mxu0 %v2291_v1 }
  0xc7   : > { %1558 = vmatpush3.xpose.msra.mxu1 %v2263_v38  ;;  %1565 = vmatpush3.xpose.msra.mxu0 %v2118_v14 }
  0xc8   : > { %1559 = vmatprep.subr.mxu1 %v2279_v54  ;;  %1566 = vmatprep.subr.mxu0 %v2121_v15 }
  0xc9   : > { %1596 = vmatprep.mubr.f32.mxu0 %v2164_v36 }
  0xcb   : > { %1560 = vmatpush3.xpose.msra.mxu1 %v2279_v54  ;;  %1567 = vmatpush3.xpose.msra.mxu0 %v2121_v15 }
  0xcc   : > { %1568 = vmatprep.subr.mxu0 %v2124_v16  ;;  %1599 = vmatprep.subr.mxu1 %v2093_v4 }
  0xce   : > { %1562 = vmatmul.mubr.f32.vlgmr.msra.gmra.mxu1 %v408_v24 }
  0xcf   : > { %1569 = vmatpush3.xpose.msra.mxu0 %v2124_v16  ;;  %1600 = vmatpush3.xpose.msra.mxu1 %v2093_v4  ;;  %v1025_v16 = vlaneseq }
  0xd0   : > { %1570 = vmatprep.subr.mxu0 %v2144_v26  ;;  %1601 = vmatprep.subr.mxu1 %v2095_v5 }
  0xd1   : > { %1631 = vmatprep.mubr.f32.mxu1 %v2164_v36  ;;  %v1027_v36 = vstv %s1304_s24 }
  0xd3   : > { %1571 = vmatpush3.xpose.msra.mxu0 %v2144_v26  ;;  %1602 = vmatpush3.xpose.msra.mxu1 %v2095_v5 }
  0xd4   : > { %1572 = vmatprep.subr.mxu0 %v2154_v31  ;;  %1603 = vmatprep.subr.mxu1 %v2097_v6 }
  0xd7   : > { %1573 = vmatpush3.xpose.msra.mxu0 %v2154_v31  ;;  %1604 = vmatpush3.xpose.msra.mxu1 %v2097_v6  ;;  %v2461_v31 = vand.u32 127, %v1025_v16 }
  0xd8   : > { %1574 = vmatprep.subr.mxu0 %v2170_v39  ;;  %1605 = vmatprep.subr.mxu1 %v2101_v9 }
  0xdb   : > { %1575 = vmatpush3.xpose.msra.mxu0 %v2170_v39  ;;  %1606 = vmatpush3.xpose.msra.mxu1 %v2101_v9 }
  0xdc   : > { %1576 = vmatprep.subr.mxu0 %v2188_v47  ;;  %1607 = vmatprep.subr.mxu1 %v2114_v13 }
  0xdf   : > { %1577 = vmatpush3.xpose.msra.mxu0 %v2188_v47  ;;  %1608 = vmatpush3.xpose.msra.mxu1 %v2114_v13 }
  0xe0   : > { %1578 = vmatprep.subr.mxu0 %v2204_v55  ;;  %1609 = vmatprep.subr.mxu1 %v2135_v21 }
  0xe3   : > { %1579 = vmatpush3.xpose.msra.mxu0 %v2204_v55  ;;  %1610 = vmatpush3.xpose.msra.mxu1 %v2135_v21 }
  0xe4   : > { %1580 = vmatprep.subr.mxu0 %v2217_v61  ;;  %1611 = vmatprep.subr.mxu1 %v2148_v28 }
  0xe7   : > { %1581 = vmatpush3.xpose.msra.mxu0 %v2217_v61  ;;  %1612 = vmatpush3.xpose.msra.mxu1 %v2148_v28 }
  0xe8   : > { %1582 = vmatprep.subr.mxu0 %v2230_v3  ;;  %1613 = vmatprep.subr.mxu1 %v2162_v35 }
  0xeb   : > { %1583 = vmatpush3.xpose.msra.mxu0 %v2230_v3  ;;  %1614 = vmatpush3.xpose.msra.mxu1 %v2162_v35 }
  0xec   : > { %1584 = vmatprep.subr.mxu0 %v2243_v23  ;;  %1615 = vmatprep.subr.mxu1 %v2181_v43 }
  0xef   : > { %1585 = vmatpush3.xpose.msra.mxu0 %v2243_v23  ;;  %1616 = vmatpush3.xpose.msra.mxu1 %v2181_v43  ;;  %v1028_v43 = vadd.s32 %v1027_v36, %v2461_v31 }
  0xf0   : > { %1586 = vmatprep.subr.mxu0 %v2256_v32  ;;  %1617 = vmatprep.subr.mxu1 %v2198_v51 }
  0xf3   : > { %1587 = vmatpush3.xpose.msra.mxu0 %v2256_v32  ;;  %1618 = vmatpush3.xpose.msra.mxu1 %v2198_v51 }
  0xf4   : > { %1588 = vmatprep.subr.mxu0 %v2270_v48  ;;  %1619 = vmatprep.subr.mxu1 %v2211_v58 }
  0xf7   : > { %1589 = vmatpush3.xpose.msra.mxu0 %v2270_v48  ;;  %1620 = vmatpush3.xpose.msra.mxu1 %v2211_v58 }
  0xf8   : > { %1590 = vmatprep.subr.mxu0 %v2285_v60  ;;  %1621 = vmatprep.subr.mxu1 %v2224_v0 }
  0xfb   : > { %1591 = vmatpush3.xpose.msra.mxu0 %v2285_v60  ;;  %1622 = vmatpush3.xpose.msra.mxu1 %v2224_v0  ;;  %v1038_v60 = vld [vmem:[#allocation3 + $0x8] sm:$0xff] }
  0xfc   : > { %1592 = vmatprep.subr.mxu0 %v2298_v19  ;;  %1623 = vmatprep.subr.mxu1 %v2237_v17 }
  0xff   : > { %1593 = vmatpush3.xpose.msra.mxu0 %v2298_v19  ;;  %1624 = vmatpush3.xpose.msra.mxu1 %v2237_v17 }
 0x100   : > { %1594 = vmatprep.subr.mxu0 %v2309_v34  ;;  %1625 = vmatprep.subr.mxu1 %v2250_v27 }
 0x103   : > { %1595 = vmatpush3.xpose.msra.mxu0 %v2309_v34  ;;  %1626 = vmatpush3.xpose.msra.mxu1 %v2250_v27  ;;  %v1037_v27 = vld [vmem:[#allocation3] sm:$0xff] }
 0x104   : > { %1627 = vmatprep.subr.mxu1 %v2263_v38 }
 0x106   : > { %1597 = vmatmul.mubr.f32.vlgmr.msra.gmra.mxu0 %v2276_v53 }
 0x107   : > { %1628 = vmatpush3.xpose.msra.mxu1 %v2263_v38  ;;  %v1009_v38 = vld [vmem:[#allocation2 + $0x8] sm:$0xff] }
 0x108   : > { %1629 = vmatprep.subr.mxu1 %v2279_v54 }
 0x109   : > { %v2464_v49 = vpop.permute.xlu0 %1030 }
 0x10a   : > { %vm1035_vm1 = vcmp.eq.s32.totalorder %v1028_v43, %v2464_v49 }
 0x10b   : > { %1630 = vmatpush3.xpose.msra.mxu1 %v2279_v54 }
 0x10d   : > { %v2468_v17 = vpop.permute.xlu0 %1033 }
 0x10e   : > { %1632 = vmatmul.mubr.f32.vlgmr.msra.gmra.mxu1 %v2276_v53  ;;  %vm1036_vm2 = vcmp.eq.s32.totalorder %v1028_v43, %v2468_v17  ;;  %v1008_v53 = vld [vmem:[#allocation2] sm:$0xff] }
 0x146   : > { %v1458_v4 = vpop.f32.mrf.mxu0 }
 0x148   : > { %v402_v5 = vpop.f32.mrf.mxu0 }
 0x14e   : > { %v1493_v6 = vpop.f32.mrf.mxu1 }
 0x14f   : > { %v570_v18 = vadd.f32 %v1493_v6, %v1458_v4 }
 0x150   : > { %v563_v13 = vpop.f32.mrf.mxu1 }
 0x151   : > { %v564_v22 = vadd.f32 %v563_v13, %v402_v5 }
 0x186   : > { %v1528_v9 = vpop.f32.mrf.mxu0 }
 0x187   : > { %v681_v26 = vadd.f32 %v1528_v9, %v570_v18 }
 0x188   : > { %v673_v14 = vpop.f32.mrf.mxu0 }
 0x189   : > { %v674_v33 = vadd.f32 %v673_v14, %v564_v22 }
 0x18e   : > { %v1563_v15 = vpop.f32.mrf.mxu1 }
 0x18f   : > { %v778_v35 = vadd.f32 %v1563_v15, %v681_v26 }
 0x190   : > { %v769_v28 = vpop.f32.mrf.mxu1 }
 0x191   : > { %v770_v41 = vadd.f32 %v769_v28, %v674_v33 }
 0x1c6   : > { %v1598_v21 = vpop.f32.mrf.mxu0 }
 0x1c7   : > { %v903_v42 = vadd.f32 %v1598_v21, %v778_v35 }
 0x1c8   : > { %v896_v39 = vpop.f32.mrf.mxu0 }
 0x1c9   : > { %v897_v47 = vadd.f32 %v896_v39, %v770_v41 }
 0x1ce   : > { %v1633_v44 = vpop.f32.mrf.mxu1 }
 0x1cf   : > { %v996_v51 = vadd.f32 %v1633_v44, %v903_v42 }
 0x1d0   : > { %v989_v55 = vpop.f32.mrf.mxu1 }
 0x1d1   : > { %v1000_v57 = vmul.f32 64.0, %v996_v51  ;;  %v990_v58 = vadd.f32 %v989_v55, %v897_v47  ;;  %v1012_v61 = vmul.f32 1.442695, %v996_v51  ;;  %v1040_v25 = vsel %vm1036_vm2, %v996_v51, 0.0 }
 0x1d3   : > { %1007 = vst [vmem:[%s1005_s9 + $0x20] sm:$0xff] %v1000_v57  ;;  %v999_v63 = vmul.f32 64.0, %v990_v58  ;;  %v1010_v0 = vmul.f32 1.442695, %v990_v58  ;;  %v1039_v3 = vsel %vm1035_vm1, %v990_v58, 0.0  ;;  %1744 = vpow2.f32 %v1012_v61 }
 0x1d4   : > { %1041 = vadd.xlane.f32.xlu0 %v1039_v3 }
 0x1d5   : > { %1006 = vst [vmem:[%s1005_s9] sm:$0xff] %v999_v63  ;;  %1746 = vpow2.f32 %v1010_v0 }
 0x1e0   : > { %v1745_v8 = vpop.eup %1744 }
 0x1e1   : > { %1016 = vadd.xlane.f32.xlu1 %v1745_v8 }
 0x1e2   : > { %v1747_v23 = vpop.eup %1746 }
 0x1e5   : > { %1014 = vadd.xlane.f32.xlu1 %v1747_v23 }
 0x1e9   : > { %1043 = vadd.xlane.f32.xlu1 %v1040_v25 }
 0x25d   : > { %v1042_v32 = vpop.xlane.xlu0 %1041 }
 0x25e   : > { %v1045_v37 = vadd.f32 %v1042_v32, %v1037_v27 }
 0x260   : > { %1047 = vst.msk [vmem:[#allocation3] sm:$0xff] %vm1020_vm3, %v1045_v37 }
 0x26a   : > { %v1017_v48 = vpop.xlane.xlu1 %1016 }
 0x26b   : > { %v1019_v52 = vadd.f32 %v1017_v48, %v1009_v38 }
 0x26d   : > { %1022 = vst.msk [vmem:[#allocation2 + $0x8] sm:$0xff] %vm1020_vm3, %v1019_v52 }
 0x26e   : > { %v1015_v54 = vpop.xlane.xlu1 %1014 }
 0x26f   : > { %v1018_v59 = vadd.f32 %v1015_v54, %v1008_v53 }
 0x271   : > { %1021 = vst.msk [vmem:[#allocation2] sm:$0xff] %vm1020_vm3, %v1018_v59  ;;  %1052 = sbr.rel (%p1306_p6) target bundleno = 804 (0x324), region = 44 }
 0x272   : > { %v1044_v62 = vpop.xlane.xlu1 %1043 }
 0x273   : > { %v1046_v1 = vadd.f32 %v1044_v62, %v1038_v60 }
 0x275   : > { %1048 = vst.msk [vmem:[#allocation3 + $0x8] sm:$0xff] %vm1020_vm3, %v1046_v1 }
 0x276   : > { %v1053_v2 = vld [vmem:[#allocation3] sm:$0xff]  ;;  %v1916_v20 = vmov 0   ;;  %v1060_v30 = vld [vmem:[#allocation2 + $0x8] sm:$0xff]  ;;  %v1075_v14 = vadd.s32 128, %v2461_v31  ;;  %v1076_v15 = vadd.s32 256, %v2461_v31  ;;  %v1077_v16 = vadd.s32 384, %v2461_v31 }
 0x277   : > { %1748 = vset.pattern.permute.xlu0 %v1916_v20  ;;  %v1055_v24 = vmul.f32 1.442695, %v1053_v2  ;;  %vm1078_vm4 = vcmp.eq.s32.totalorder %v2461_v31, %v2464_v49  ;;  %v1086_v18 = vld [vmem:[%s2087_s7] sm:$0xff]  ;;  %v1087_v21 = vld [vmem:[%s2087_s7 + $0x8] sm:$0xff]  ;;  %v1088_v22 = vld [vmem:[%s2087_s7 + $0x10] sm:$0xff]  ;;  %vm1082_vm8 = vcmp.eq.s32.totalorder %v2461_v31, %v2468_v17 }
 0x278   : > { %v1059_v7 = vld [vmem:[#allocation2] sm:$0xff]  ;;  %vm1079_vm5 = vcmp.eq.s32.totalorder %v1075_v14, %v2464_v49  ;;  %vm1080_vm6 = vcmp.eq.s32.totalorder %v1076_v15, %v2464_v49  ;;  %vm1081_vm7 = vcmp.eq.s32.totalorder %v1077_v16, %v2464_v49  ;;  %v1089_v26 = vld [vmem:[%s2087_s7 + $0x18] sm:$0xff]  ;;  %vm1083_vm9 = vcmp.eq.s32.totalorder %v1075_v14, %v2468_v17  ;;  %v1091_v49 = vld [vmem:[%s2087_s7 + $0x28] sm:$0xff] }
 0x279   : > { %1749 = vrcp.f32 %v1059_v7  ;;  %vm1084_vm10 = vcmp.eq.s32.totalorder %v1076_v15, %v2468_v17  ;;  %vm1085_vm11 = vcmp.eq.s32.totalorder %v1077_v16, %v2468_v17  ;;  %v1090_v47 = vld [vmem:[%s2087_s7 + $0x20] sm:$0xff]  ;;  %v1092_v51 = vld [vmem:[%s2087_s7 + $0x30] sm:$0xff]  ;;  %v1093_v55 = vld [vmem:[%s2087_s7 + $0x38] sm:$0xff] }
 0x27a   : > { %1751 = vrcp.f32 %v1060_v30 }
 0x27b   : > { %1753 = vpow2.f32 %v1055_v24 }
 0x27c   : > { %v1054_v19 = vld [vmem:[#allocation3 + $0x8] sm:$0xff] }
 0x27d   : > { %v1057_v29 = vmul.f32 1.442695, %v1054_v19 }
 0x27f   : > { %1755 = vpow2.f32 %v1057_v29 }
 0x286   : > { %v1750_v34 = vpop.eup %1749 }
 0x287   : > { %v1752_v40 = vpop.eup %1751 }
 0x288   : > { %v1754_v45 = vpop.eup %1753 }
 0x289   : > { %v1062_v50 = vmul.f32 %v1754_v45, %v1750_v34 }
 0x28b   : > { %v1065_v10 = vsub.f32 0.0, %v1062_v50 }
 0x28c   : > { %v1756_v46 = vpop.eup %1755 }
 0x28d   : > { %v1064_v56 = vmul.f32 %v1756_v46, %v1752_v40  ;;  %v1067_v12 = vmul.f32 1.442695, %v1065_v10 }
 0x28f   : > { %v1066_v11 = vsub.f32 0.0, %v1064_v56  ;;  %1757 = vpow2.f32 %v1067_v12 }
 0x291   : > { %v1069_v4 = vmul.f32 1.442695, %v1066_v11 }
 0x293   : > { %1759 = vpow2.f32 %v1069_v4 }
 0x29c   : > { %v1758_v5 = vpop.eup %1757 }
 0x29d   : > { %v1071_v9 = vmul.f32 32.0, %v1758_v5 }
 0x29f   : > { %1096 = vperm.xlu0 %1748, %v1071_v9   ;;  %1073 = vst.msk [vmem:[%s2085_s18] sm:$0xff] %vm1020_vm3, %v1071_v9 }
 0x2a0   : > { %v1760_v6 = vpop.eup %1759 }
 0x2a1   : > { %v1072_v13 = vmul.f32 32.0, %v1760_v6 }
 0x2a3   : > { %1074 = vst.msk [vmem:[%s2085_s18 + $0x8] sm:$0xff] %vm1020_vm3, %v1072_v13  ;;  %1101 = vperm.xlu0 %1748, %v1072_v13  }
 0x31a   : > { %v1097_v28 = vpop.permute.xlu0 %1096 }
 0x31b   : > { %v1104_v33 = vsel %vm1078_vm4, %v1097_v28, 0.0  ;;  %v1105_v35 = vsel %vm1079_vm5, %v1097_v28, 0.0  ;;  %v1106_v36 = vsel %vm1080_vm6, %v1097_v28, 0.0  ;;  %v1107_v39 = vsel %vm1081_vm7, %v1097_v28, 0.0 }
 0x31c   : > { %v1112_v41 = vsub.f32 %v1086_v18, %v1104_v33  ;;  %v1113_v42 = vsub.f32 %v1087_v21, %v1105_v35  ;;  %v1114_v43 = vsub.f32 %v1088_v22, %v1106_v36  ;;  %v1115_v44 = vsub.f32 %v1089_v26, %v1107_v39 }
 0x31e   : > { %1120 = vst [vmem:[%s2087_s7] sm:$0xff] %v1112_v41  ;;  %1121 = vst [vmem:[%s2087_s7 + $0x8] sm:$0xff] %v1113_v42  ;;  %v1102_v57 = vpop.permute.xlu0 %1101 }
 0x31f   : > { %1122 = vst [vmem:[%s2087_s7 + $0x10] sm:$0xff] %v1114_v43  ;;  %1123 = vst [vmem:[%s2087_s7 + $0x18] sm:$0xff] %v1115_v44  ;;  %v1108_v58 = vsel %vm1082_vm8, %v1102_v57, 0.0  ;;  %v1109_v61 = vsel %vm1083_vm9, %v1102_v57, 0.0  ;;  %v1110_v63 = vsel %vm1084_vm10, %v1102_v57, 0.0  ;;  %v1111_v0 = vsel %vm1085_vm11, %v1102_v57, 0.0 }
 0x320   : > { %v1116_v3 = vsub.f32 %v1090_v47, %v1108_v58  ;;  %v1117_v8 = vsub.f32 %v1091_v49, %v1109_v61  ;;  %v1118_v23 = vsub.f32 %v1092_v51, %v1110_v63  ;;  %v1119_v25 = vsub.f32 %v1093_v55, %v1111_v0 }
 0x322   : > { %1124 = vst [vmem:[%s2087_s7 + $0x20] sm:$0xff] %v1116_v3  ;;  %1125 = vst [vmem:[%s2087_s7 + $0x28] sm:$0xff] %v1117_v8 }
 0x323   : > { %1126 = vst [vmem:[%s2087_s7 + $0x30] sm:$0xff] %v1118_v23  ;;  %1127 = vst [vmem:[%s2087_s7 + $0x38] sm:$0xff] %v1119_v25 }
 0x324 PF: > { %s1315_s21 = sshll.u32 %s1897_s22, 10  ;;  %s1148_s30 = sshll.u32 %s2087_s7, 4  ;;  %s2525_s30 = int_to_ptr.vmem [resolvable:$true] %s1148_s30 }
 0x325   : > { %s2522_s27 = scalar_lea.hbm %s2592_s3, %s1315_s21  ;;  %s2529_s6 = scalar_lea.sflag [#allocation6], %s258_s28 }
 0x326   : > { %s1789_s8 = scalar_lea.vmem %s2525_s30, 1024  ;;  %s1917_s22 = smov [#allocation7]  }
 0x327   : > { %p1790_p7 = scmp.ne.s32.totalorder %s2525_s30, %s1789_s8  ;;  %s1793_s13 = sshll.u32 %s1917_s22, 4  ;;  %s1794_s13 = int_to_ptr.vmem [resolvable:$false] %s1793_s13 }
 0x328   : > { %s1795_s23 = scalar_lea.vmem %s1794_s13, 2048  ;;  %p1796_p11 = scmp.lt.s32.totalorder %s2525_s30, %s1794_s13 }
 0x329   : > { %p1791_p9 = pnand %p1790_p7, %p2033_p12  ;;  %p1797_p13 = scmp.lt.s32.totalorder %s1795_s23, %s1789_s8 }
 0x32b   : > { %p1792_p10 = pneg %p1791_p9  ;;  %p1798_p3 = por %p1797_p13, %p1796_p11 }
 0x32d   : > { %p1799_p0 = pnand %p1798_p3, %p1792_p10 }
 0x32f   : > { %1802 = shalt.err (!%p1799_p0)
}
 0x330   : > { %s1803_s28 = scalar_lea.hbm %s2522_s27, 1024  ;;  %s1807_s24 = scalar_lea.hbm %s2592_s3, 4096 }
 0x331   : > { %p1804_p1 = scmp.ne.s32.totalorder %s2522_s27, %s1803_s28  ;;  %p1808_p8 = scmp.lt.s32.totalorder %s2522_s27, %s2592_s3 }
 0x332   : > { %p1809_p6 = scmp.lt.s32.totalorder %s1807_s24, %s1803_s28 }
 0x333   : > { %p1805_p5 = pnand %p1804_p1, %p2033_p12 }
 0x334   : > { %p1810_p7 = por %p1809_p6, %p1808_p8 }
 0x335   : > { %p1806_p4 = pneg %p1805_p5 }
 0x337   : > { %p1811_p9 = pnand %p1810_p7, %p1806_p4 }
 0x339   : > { %1814 = shalt.err (!%p1811_p9)
}
 0x33a   : > { %s1918_s9 = smov 512   ;;  %s1919_s21 = smov 32  }
 0x33b   : > { %1636 = dma.vmem_to_hbm [thread:$0]  (%p2033_p12), %s2525_s30, 1024, %s2522_s27, %s2529_s6, %s1918_s9, %s1918_s9, %s1919_s21  }
 0x33c PF: > { %p1647_p10 = scmp.ge.s32.totalorder %s1909_s25, 2  ;;  %s1167_s26 = sand.u32 1, %s1869_s15  }
 0x33d   : > { %s1168_s10 = scalar_lea.sflag [#allocation6], %s1167_s26 }
 0x33e   : > { %p1643_p11 = pnand %p1647_p10, %p2041_p2 }
 0x340   : > { %p1644_p13 = pneg %p1643_p11 }
 0x342   : > { %1864 = dma.done.wait (%p1644_p13), %s1168_s10, 1024  }
 0x343   : > { %1866 = vsyncadd (%p1644_p13), %s1168_s10, 4294966272  ;;  %s21_s25 = sadd.s32 1, %s1909_s25   ;;  %s2608_s12 = sld [smem:[#allocation14_spill]] }
 0x344   : > { %p18_p3 = scmp.ge.s32.totalorder %s21_s25, 18   ;;  %s2609_s21 = sld [smem:[#allocation10_spill]] }
 0x345   : > { %s2610_s22 = sld [smem:[#allocation11_spill]]  ;;  %s2613_s15 = smov %s1873_s16 }
 0x346   : > { %s2611_s23 = sld [smem:[#allocation12_spill]]  ;;  %s2614_s16 = smov %s1877_s17 }
 0x347   : > { %s2612_s24 = sld [smem:[#allocation13_spill]]  ;;  %s2615_s17 = smov %s2031_s11 }
 0x348   : > { %s2616_s18 = smov %s1885_s19  ;;  %s2617_s19 = smov %s1889_s20 }
 0x349   : > { %s2618_s20 = smov %s2608_s12  ;;  %20 = sbr.rel (!%p18_p3) target bundleno = 9 (0x9), region = 104 }
 0x34e   :  { %1181 = vsyncpa [#allocation5], 1 }
 0x34f   :  { %1183 = vsyncpa [#allocation5 + $0x1], 1 }
 0x350   :  { %1184 = vsyncpa [#allocation6], 1 }
 0x351   :  { %1186 = vsyncpa [#allocation6 + $0x1], 1 }

</bundles_post_ra>
